<compile_context>
chip_gen: v7x
topology: tpu7x:2x2x1
jax: 0.10.0
libtpu: 0.0.40
codegen_flags: <defaults>
</compile_context>

<pallas_src>
import jax
import jax.numpy as jnp
import numpy as np
from jax.experimental import pallas as pl
from jax.experimental.pallas import tpu as pltpu


_TARGET_TILE_BYTES = 2 * 1024 * 1024   # ~1-4 MiB tiles already hit ~85% of HBM roofline
_LANE = 128


# ---------------------------------------------------------------------------
# Primary path: one grid step processes TB batch rows of the full (C, HW) slab.
# ---------------------------------------------------------------------------
def _se_kernel(x_ref, wd_ref, bd_ref, wu_ref, bu_ref, o_ref):
    # Squeeze: L2 norm over the spatial (lane) axis.  The f32 upcast fuses into
    # the cross-lane reduce; no full-tile f32 temporary is kept live.
    ssq = jnp.sum(jnp.square(x_ref[...].astype(jnp.float32)), axis=-1)   # (tb, C)
    gx = jnp.sqrt(ssq)

    # Gx.mean(dim=-1, keepdim=True) is over a size-1 dim, so s = Gx/(Gx+1e-6).
    # Exact divide: it only touches a (tb, C) tensor, essentially free.
    s = gx / (gx + 1e-6)

    # Excitation: the two 1x1 convs on (B, C, 1, 1) are tiny dense layers (MXU).
    h = jnp.dot(s, wd_ref[...], preferred_element_type=jnp.float32) + bd_ref[...]
    h = jnp.maximum(h, 0.0)                                              # (tb, I)
    u = jnp.dot(h, wu_ref[...], preferred_element_type=jnp.float32) + bu_ref[...]
    scale = jax.nn.sigmoid(u).astype(o_ref.dtype)                        # (tb, C)

    # Scale: re-read x from the VMEM ref (bounds its live range across the
    # matmuls; VMEM re-loads are nearly free) — one VPU pass in x.dtype.
    o_ref[...] = x_ref[...] * scale[:, :, None]


def _pick_tb(B, per_batch_bytes, budget_bytes):
    """Batch rows per grid step.  Returns None if even tb=1 overflows the VMEM
    budget (caller switches to the HW-tiled two-pass fallback)."""
    divisors = [d for d in range(1, B + 1) if B % d == 0]
    # in + out tiles, double-buffered, plus ~1 tile of in-kernel temporaries.
    fits = [d for d in divisors if 6 * d * per_batch_bytes <= budget_bytes]
    if not fits:
        return None
    within_target = [d for d in fits if d * per_batch_bytes <= _TARGET_TILE_BYTES]
    cands = within_target if within_target else [min(fits)]
    # Prefer enough steps to pipeline (>=8), then >=4, then >=2 (v7x has 2 TCs).
    for min_steps in (8, 4, 2):
        ok = [d for d in cands if B // d >= min_steps]
        if ok:
            return max(ok)
    return max(cands)


# ---------------------------------------------------------------------------
# Fallback path (large C*HW, esp. v7x's 64 MiB/TC): two passes over HW chunks.
#   Pass 1: accumulate sum-of-squares per (b, c) in an f32 scratch, emit the
#           sigmoid scale at the last chunk.
#   Pass 2: elementwise x * scale, streaming the same chunks.
# ---------------------------------------------------------------------------
def _se_reduce_kernel(x_ref, wd_ref, bd_ref, wu_ref, bu_ref, scale_ref, acc_ref):
    hw_idx = pl.program_id(1)

    @pl.when(hw_idx == 0)
    def _():
        acc_ref[...] = jnp.zeros_like(acc_ref)

    acc_ref[...] += jnp.sum(jnp.square(x_ref[...].astype(jnp.float32)), axis=-1)

    @pl.when(hw_idx == pl.num_programs(1) - 1)
    def _():
        gx = jnp.sqrt(acc_ref[...])                                      # (1, C)
        s = gx / (gx + 1e-6)
        h = jnp.maximum(
            jnp.dot(s, wd_ref[...], preferred_element_type=jnp.float32) + bd_ref[...],
            0.0)
        u = jnp.dot(h, wu_ref[...], preferred_element_type=jnp.float32) + bu_ref[...]
        scale_ref[...] = jax.nn.sigmoid(u)[..., None]                    # (1, C, 1)


def _se_apply_kernel(x_ref, scale_ref, o_ref):
    o_ref[...] = x_ref[...] * scale_ref[...].astype(o_ref.dtype)


def _pick_hw_chunk(HWp, C, itemsize, budget_bytes):
    n_vregs = HWp // _LANE
    cands = [_LANE * k for k in range(1, n_vregs + 1) if n_vregs % k == 0]
    fits = [c for c in cands if 6 * C * c * itemsize <= budget_bytes]
    if not fits:
        fits = [_LANE]
    within = [c for c in fits if C * c * itemsize <= _TARGET_TILE_BYTES]
    return max(within) if within else min(fits)


def _se_block_hw_tiled(x_flat, w_down, bd, w_up, bu, vmem_limit, hw_chunk=None):
    B, C, HW = x_flat.shape
    internal = w_down.shape[1]
    itemsize = x_flat.dtype.itemsize

    HWp = ((HW + _LANE - 1) // _LANE) * _LANE
    if HWp != HW:
        # Zero padding is numerically safe (adds 0 to the norm, 0*scale = 0).
        # TODO(synk): mask the ragged tail in-kernel instead of padding; only
        # matters for huge slabs whose HW is not a multiple of 128.
        x_flat = jnp.pad(x_flat, ((0, 0), (0, 0), (0, HWp - HW)))

    budget = int(vmem_limit * 0.8)
    if hw_chunk is None:
        hw_chunk = _pick_hw_chunk(HWp, C, itemsize, budget)
    n_hw = HWp // hw_chunk

    # Pass 1: per-(batch, channel) sum of squares -> sigmoid scale (B, C, 1).
    scale = pl.pallas_call(
        _se_reduce_kernel,
        out_shape=jax.ShapeDtypeStruct((B, C, 1), jnp.float32),
        grid_spec=pltpu.PrefetchScalarGridSpec(
            num_scalar_prefetch=0,
            grid=(B, n_hw),
            in_specs=[
                pl.BlockSpec((1, C, hw_chunk), lambda b, h: (b, 0, h)),
                pl.BlockSpec((C, internal), lambda b, h: (0, 0)),
                pl.BlockSpec((1, internal), lambda b, h: (0, 0)),
                pl.BlockSpec((internal, C), lambda b, h: (0, 0)),
                pl.BlockSpec((1, C), lambda b, h: (0, 0)),
            ],
            out_specs=pl.BlockSpec((1, C, 1), lambda b, h: (b, 0, 0)),
            scratch_shapes=[pltpu.VMEM((1, C), jnp.float32)],
        ),
        compiler_params=pltpu.CompilerParams(
            dimension_semantics=("parallel", "arbitrary"),
            vmem_limit_bytes=vmem_limit,
        ),
    )(x_flat, w_down, bd, w_up, bu)

    # Pass 2: broadcast multiply, streaming the same HW chunks.
    out_flat = pl.pallas_call(
        _se_apply_kernel,
        out_shape=jax.ShapeDtypeStruct((B, C, HWp), x_flat.dtype),
        grid_spec=pltpu.PrefetchScalarGridSpec(
            num_scalar_prefetch=0,
            grid=(B, n_hw),
            in_specs=[
                pl.BlockSpec((1, C, hw_chunk), lambda b, h: (b, 0, h)),
                pl.BlockSpec((1, C, 1), lambda b, h: (b, 0, 0)),
            ],
            out_specs=pl.BlockSpec((1, C, hw_chunk), lambda b, h: (b, 0, h)),
        ),
        compiler_params=pltpu.CompilerParams(
            dimension_semantics=("parallel", "parallel"),
            vmem_limit_bytes=vmem_limit,
        ),
    )(x_flat, scale)

    if HWp != HW:
        out_flat = out_flat[:, :, :HW]
    return out_flat


# ---------------------------------------------------------------------------
# Public wrapper.
# ---------------------------------------------------------------------------
def se_block(x, w_down, b_down, w_up, b_up, *, force_hw_tiling=False, hw_chunk=None):
    """x: (B, C, H, W).  w_down: (C, internal), w_up: (internal, C) — i.e. the
    transposes of the PyTorch Conv2d(k=1) weights squeezed to 2-D."""
    B, C, H, W = x.shape
    internal = w_down.shape[1]
    HW = H * W

    x_flat = x.reshape(B, C, HW)
    bd = b_down.reshape(1, internal)
    bu = b_up.reshape(1, C)

    # Per-TC VMEM capacity (v7x: 64 MiB, v5e/v6e: 128 MiB); leave headroom.
    try:
        vmem_cap = int(pltpu.get_tpu_info().vmem_capacity_bytes)
    except Exception:
        vmem_cap = 64 * 1024 * 1024                  # conservative fallback
    vmem_limit = int(vmem_cap * 3 // 4)
    budget = int(vmem_limit * 0.8)

    per_batch_bytes = C * HW * x.dtype.itemsize
    tb = None if force_hw_tiling else _pick_tb(B, per_batch_bytes, budget)

    if tb is None:
        out_flat = _se_block_hw_tiled(x_flat, w_down, bd, w_up, bu, vmem_limit,
                                      hw_chunk=hw_chunk)
        return out_flat.reshape(B, C, H, W)

    n_steps = B // tb
    x_in_spec = pl.BlockSpec((tb, C, HW), lambda b: (b, 0, 0))
    if (vmem_cap >= 100 * 1024 * 1024 and n_steps >= 3
            and 8 * tb * per_batch_bytes <= budget):
        # v5e/v6e (128 MiB VMEM, 1 TC): spend VMEM on pipeline depth, not tile
        # size.  Never enabled on v7x (64 MiB/TC) — the capacity gate excludes it.
        x_in_spec = pl.BlockSpec((tb, C, HW), lambda b: (b, 0, 0),
                                 pipeline_mode=pl.Buffered(3))

    out_flat = pl.pallas_call(
        _se_kernel,
        out_shape=jax.ShapeDtypeStruct((B, C, HW), x.dtype),
        grid_spec=pltpu.PrefetchScalarGridSpec(
            num_scalar_prefetch=0,
            grid=(n_steps,),
            in_specs=[
                x_in_spec,
                pl.BlockSpec((C, internal), lambda b: (0, 0)),
                pl.BlockSpec((1, internal), lambda b: (0, 0)),
                pl.BlockSpec((internal, C), lambda b: (0, 0)),
                pl.BlockSpec((1, C), lambda b: (0, 0)),
            ],
            out_specs=pl.BlockSpec((tb, C, HW), lambda b: (b, 0, 0)),
        ),
        compiler_params=pltpu.CompilerParams(
            dimension_semantics=("parallel",),
            vmem_limit_bytes=vmem_limit,
        ),
    )(x_flat, w_down, bd, w_up, bu)

    return out_flat.reshape(B, C, H, W)


def se_block_ref(x, w_down, b_down, w_up, b_up):
    """Pure-JAX reference matching the PyTorch forward."""
    gx = jnp.sqrt(jnp.sum(x * x, axis=(2, 3), keepdims=True))     # (B, C, 1, 1)
    s = gx / (jnp.mean(gx, axis=-1, keepdims=True) + 1e-6)
    s2 = s[:, :, 0, 0]                                            # (B, C)
    h = jax.nn.relu(s2 @ w_down + b_down)                         # (B, internal)
    u = jax.nn.sigmoid(h @ w_up + b_up)                           # (B, C)
    return x * u[:, :, None, None]


if __name__ == "__main__":
    # Small but representative SE shapes; HW=196 exercises the ragged-lane
    # (unpadded) store path of the primary kernel.
    B, C, internal, H, W = 2, 8, 4, 14, 14

    key = jax.random.PRNGKey(0)
    kx, kwd, kbd, kwu, kbu = jax.random.split(key, 5)

    x = jax.random.normal(kx, (B, C, H, W), dtype=jnp.float32)

    # Conv2d(C -> internal, k=1) weight is (internal, C, 1, 1); we store its
    # transpose (C, internal) so the kernel does s @ Wd.  Same for up.
    w_down = jax.random.normal(kwd, (C, internal), dtype=jnp.float32) * 0.1
    b_down = jax.random.normal(kbd, (internal,), dtype=jnp.float32) * 0.1
    w_up = jax.random.normal(kwu, (internal, C), dtype=jnp.float32) * 0.1
    b_up = jax.random.normal(kbu, (C,), dtype=jnp.float32) * 0.1

    out = jax.block_until_ready(se_block(x, w_down, b_down, w_up, b_up))
    ref = se_block_ref(x, w_down, b_down, w_up, b_up)
    np.testing.assert_allclose(np.asarray(out), np.asarray(ref),
                               rtol=1e-4, atol=1e-4)

    # Also exercise the HW-tiled two-pass fallback (the large-C*HW / v7x path).
    x2 = jax.random.normal(kx, (B, C, 16, 16), dtype=jnp.float32)
    out2 = jax.block_until_ready(
        se_block(x2, w_down, b_down, w_up, b_up,
                 force_hw_tiling=True, hw_chunk=128))
    ref2 = se_block_ref(x2, w_down, b_down, w_up, b_up)
    np.testing.assert_allclose(np.asarray(out2), np.asarray(ref2),
                               rtol=1e-4, atol=1e-4)

    print("KERNEL_OK")
</pallas_src>

<mosaic_0001>
module attributes {stable_mosaic.version = 11 : i64} {
  func.func @_se_kernel(%arg0: i32, %arg1: memref<1x8x196xf32, #tpu.memory_space<vmem>>, %arg2: memref<8x4xf32, #tpu.memory_space<vmem>>, %arg3: memref<1x4xf32, #tpu.memory_space<vmem>>, %arg4: memref<4x8xf32, #tpu.memory_space<vmem>>, %arg5: memref<1x8xf32, #tpu.memory_space<vmem>>, %arg6: memref<1x8x196xf32, #tpu.memory_space<vmem>>) attributes {dimension_semantics = [#tpu.dimension_semantics<parallel>], iteration_bounds = array<i64: 2>, scalar_prefetch = 0 : i64, scratch_operands = 0 : i64, tpu.core_type = #tpu.core_type<tc>, window_params = [{transform_indices = @transform_0, window_bounds = array<i64: 1, 8, 196>}, {pipeline_mode = #tpu.pipeline_mode<synchronous>, transform_indices = @transform_1, window_bounds = array<i64: 8, 4>}, {pipeline_mode = #tpu.pipeline_mode<synchronous>, transform_indices = @transform_2, window_bounds = array<i64: 1, 4>}, {pipeline_mode = #tpu.pipeline_mode<synchronous>, transform_indices = @transform_3, window_bounds = array<i64: 4, 8>}, {pipeline_mode = #tpu.pipeline_mode<synchronous>, transform_indices = @transform_4, window_bounds = array<i64: 1, 8>}, {transform_indices = @transform_5, window_bounds = array<i64: 1, 8, 196>}]} {
    %c0 = arith.constant 0 : index
    %c0_0 = arith.constant 0 : index
    %c0_1 = arith.constant 0 : index
    %0 = vector.load %arg1[%c0, %c0_0, %c0_1] : memref<1x8x196xf32, #tpu.memory_space<vmem>>, vector<1x8x196xf32>
    %1 = arith.mulf %0, %0 : vector<1x8x196xf32>
    %cst = arith.constant dense<0.000000e+00> : vector<1x8xf32>
    %2 = vector.multi_reduction <add>, %1, %cst [2] : vector<1x8x196xf32> to vector<1x8xf32>
    %3 = math.sqrt %2 : vector<1x8xf32>
    %cst_2 = arith.constant 9.99999997E-7 : f32
    %4 = vector.broadcast %cst_2 : f32 to vector<1x8xf32>
    %5 = arith.addf %3, %4 : vector<1x8xf32>
    %6 = arith.divf %3, %5 : vector<1x8xf32>
    %c0_3 = arith.constant 0 : index
    %c0_4 = arith.constant 0 : index
    %7 = vector.load %arg2[%c0_3, %c0_4] : memref<8x4xf32, #tpu.memory_space<vmem>>, vector<8x4xf32>
    %cst_5 = arith.constant dense<0.000000e+00> : vector<1x4xf32>
    %8 = tpu.matmul %6, %7, %cst_5 {dimension_numbers = #tpu.dot_dimension_numbers<[1], [0], [0], [1], [0, 0, 1, 1], [], []>} : vector<1x8xf32>, vector<8x4xf32>, vector<1x4xf32> -> vector<1x4xf32>
    %c0_6 = arith.constant 0 : index
    %c0_7 = arith.constant 0 : index
    %9 = vector.load %arg3[%c0_6, %c0_7] : memref<1x4xf32, #tpu.memory_space<vmem>>, vector<1x4xf32>
    %10 = arith.addf %8, %9 : vector<1x4xf32>
    %cst_8 = arith.constant 0.000000e+00 : f32
    %11 = vector.broadcast %cst_8 : f32 to vector<1x4xf32>
    %12 = arith.maximumf %10, %11 : vector<1x4xf32>
    %c0_9 = arith.constant 0 : index
    %c0_10 = arith.constant 0 : index
    %13 = vector.load %arg4[%c0_9, %c0_10] : memref<4x8xf32, #tpu.memory_space<vmem>>, vector<4x8xf32>
    %cst_11 = arith.constant dense<0.000000e+00> : vector<1x8xf32>
    %14 = tpu.matmul %12, %13, %cst_11 {dimension_numbers = #tpu.dot_dimension_numbers<[1], [0], [0], [1], [0, 0, 1, 1], [], []>} : vector<1x4xf32>, vector<4x8xf32>, vector<1x8xf32> -> vector<1x8xf32>
    %c0_12 = arith.constant 0 : index
    %c0_13 = arith.constant 0 : index
    %15 = vector.load %arg5[%c0_12, %c0_13] : memref<1x8xf32, #tpu.memory_space<vmem>>, vector<1x8xf32>
    %16 = arith.addf %14, %15 : vector<1x8xf32>
    %17 = arith.negf %16 : vector<1x8xf32>
    %18 = math.exp %17 : vector<1x8xf32>
    %cst_14 = arith.constant 1.000000e+00 : f32
    %19 = vector.broadcast %cst_14 : f32 to vector<1x8xf32>
    %20 = arith.addf %19, %18 : vector<1x8xf32>
    %21 = arith.divf %19, %20 : vector<1x8xf32>
    %c0_15 = arith.constant 0 : index
    %c0_16 = arith.constant 0 : index
    %c0_17 = arith.constant 0 : index
    %22 = vector.load %arg1[%c0_15, %c0_16, %c0_17] : memref<1x8x196xf32, #tpu.memory_space<vmem>>, vector<1x8x196xf32>
    %23 = vector.shape_cast %21 : vector<1x8xf32> to vector<1x8x1xf32>
    %24 = vector.broadcast %23 : vector<1x8x1xf32> to vector<1x8x196xf32>
    %25 = arith.mulf %22, %24 : vector<1x8x196xf32>
    %c0_18 = arith.constant 0 : index
    %c0_19 = arith.constant 0 : index
    %c0_20 = arith.constant 0 : index
    %26 = vector.load %arg6[%c0_18, %c0_19, %c0_20] : memref<1x8x196xf32, #tpu.memory_space<vmem>>, vector<1x8x196xf32>
    tpu.vector_store %arg6[%c0_18, %c0_19, %c0_20], %25 {strides = array<i32>} : memref<1x8x196xf32, #tpu.memory_space<vmem>>, vector<1x8x196xf32>,
    return
  }
  func.func @transform_0(%arg0: i32) -> (i32, i32, i32) {
    %c0_i32 = arith.constant 0 : i32
    %c0_i32_0 = arith.constant 0 : i32
    %c0_i32_1 = arith.constant 0 : i32
    return %arg0, %c0_i32, %c0_i32_0 : i32, i32, i32
  }
  func.func @transform_1(%arg0: i32) -> (i32, i32) {
    %c0_i32 = arith.constant 0 : i32
    %c0_i32_0 = arith.constant 0 : i32
    %c0_i32_1 = arith.constant 0 : i32
    return %c0_i32, %c0_i32_0 : i32, i32
  }
  func.func @transform_2(%arg0: i32) -> (i32, i32) {
    %c0_i32 = arith.constant 0 : i32
    %c0_i32_0 = arith.constant 0 : i32
    %c0_i32_1 = arith.constant 0 : i32
    return %c0_i32, %c0_i32_0 : i32, i32
  }
  func.func @transform_3(%arg0: i32) -> (i32, i32) {
    %c0_i32 = arith.constant 0 : i32
    %c0_i32_0 = arith.constant 0 : i32
    %c0_i32_1 = arith.constant 0 : i32
    return %c0_i32, %c0_i32_0 : i32, i32
  }
  func.func @transform_4(%arg0: i32) -> (i32, i32) {
    %c0_i32 = arith.constant 0 : i32
    %c0_i32_0 = arith.constant 0 : i32
    %c0_i32_1 = arith.constant 0 : i32
    return %c0_i32, %c0_i32_0 : i32, i32
  }
  func.func @transform_5(%arg0: i32) -> (i32, i32, i32) {
    %c0_i32 = arith.constant 0 : i32
    %c0_i32_0 = arith.constant 0 : i32
    %c0_i32_1 = arith.constant 0 : i32
    return %arg0, %c0_i32, %c0_i32_0 : i32, i32, i32
  }
}

</mosaic_0001>

<bundles_post_ra>
// kernel: tpu_custom_call.1
= control target key start
LH: loop header
LB: loop body
LE: loop exit
PB: predicated region body
PF: predicated region fallthrough
CT: control target
= control target key end

     0   :  { %10 = vsyncpa [#allocation3], 0  ;;  %s936_s0 = inlined_call_operand.hbm [shape: f32[2,8,196], index: 0, kind: input, shape index: {}]   ;;  %s937_s1 = inlined_call_operand.vmem [shape: f32[8,4], index: 1, kind: input, shape index: {}]   ;;  %s938_s2 = inlined_call_operand.vmem [shape: f32[1,4], index: 2, kind: input, shape index: {}]   ;;  %s939_s3 = inlined_call_operand.vmem [shape: f32[4,8], index: 3, kind: input, shape index: {}]   ;;  %s940_s4 = inlined_call_operand.vmem [shape: f32[1,8], index: 4, kind: input, shape index: {}]   ;;  %s941_s5 = inlined_call_operand.hbm [shape: f32[2,8,196], index: 5, kind: output, shape index: {}]  }
   0x1   :  { %12 = vsyncpa [#allocation3 + $0x1], 0 }
   0x2   :  { %13 = vsyncpa [#allocation4], 0 }
   0x3   :  { %15 = vsyncpa [#allocation4 + $0x1], 0  ;;  %s747_s18 = smov 0   ;;  %s749_s19 = smov 0  }
   0x4   :  { %s751_s20 = smov 0   ;;  %s753_s21 = smov 0  }
   0x5 LB: > { %s768_s22 = sadd.s32 4294967295, %s711_s21   ;;  %s525_s23 = sadd.s32 4294967294, %s711_s21   ;;  %s711_s21 = sphi %s753_s21, %s956_s21   ;;  %s707_s20 = sphi %s751_s20, %s955_s20   ;;  %s703_s19 = sphi %s749_s19, %s954_s19   ;;  %s699_s18 = sphi %s747_s18, %s953_s18  }
   0x6   : > { %s772_s24 = sadd.s32 1, %s711_s21   ;;  %s28_s25 = sadd.s32 1, %s707_s20 }
   0x7   : > { %s25_s26 = ssub.s32 %s711_s21, %s772_s24  ;;  %p35_p0 = scmp.ne.s32.totalorder %s707_s20, %s703_s19 }
   0x8   : > { %p26_p1 = scmp.eq.s32.totalorder %s25_s26, 0  ;;  %p36_p2 = scmp.eq.s32.totalorder %s711_s21, 0 }
   0x9   : > { %p41_p3 = scmp.ne.s32.totalorder %s703_s19, %s699_s18  ;;  %p42_p4 = scmp.eq.s32.totalorder %s768_s22, 0 }
   0xa   : > { %s784_s27 = scalar_select %p26_p1, %s707_s20, %s28_s25  }
   0xb   : > { %p786_p5 = por %p36_p2, %p35_p0  ;;  %p790_p6 = por %p42_p4, %p41_p3 }
   0xc   : > { %p149_p7 = scmp.eq.s32.totalorder %s768_s22, 1  ;;  %p155_p8 = scmp.eq.s32.totalorder %s525_s23, 1 }
   0xd   : > { %p571_p10 = scmp.lt.s32.totalorder %s711_s21, 2  ;;  %s187_s7 = sand.u32 1, %s707_s20  }
   0xe   : > { %p797_p11 = por %p149_p7, %p35_p0  ;;  %p801_p12 = por %p155_p8, %p41_p3 }
   0xf   : > { %s543_s8 = sshll.u32 %s711_s21, 8  ;;  %s528_s9 = sshll.u32 %s187_s7, 4 }
  0x10   : > { %s945_s30 = scalar_select %p797_p11, 1, 0 }
  0x11   : > { %s946_s6 = scalar_select %p801_p12, 1, 0 }
  0x12   : > { %s810_s12 = scalar_lea.hbm %s936_s0, %s543_s8  ;;  %s191_s13 = scalar_lea.vmem [#allocation2], %s528_s9 }
  0x13   : > { %s199_s14 = sshll.u32 %s191_s13, 4  ;;  %p814_p13 = pnand %p571_p10, %p786_p5  ;;  %s818_s14 = int_to_ptr.vmem [resolvable:$true] %s199_s14 }
  0x14   : > { %s188_s16 = scalar_lea.sflag [#allocation3], %s187_s7  ;;  %s615_s17 = scalar_lea.hbm %s810_s12, 256 }
  0x15   : > { %p616_p2 = scmp.ne.s32.totalorder %s810_s12, %s615_s17  ;;  %p617_p3 = pneg %p814_p13 }
  0x16   : > { %s620_s26 = scalar_lea.hbm %s936_s0, 512  ;;  %p621_p5 = scmp.lt.u32.totalorder %s810_s12, %s936_s0 }
  0x17   : > { %p618_p4 = pnand %p617_p3, %p616_p2  ;;  %p622_p8 = scmp.lt.u32.totalorder %s620_s26, %s615_s17 }
  0x18   : > { %p624_p9 = scmp.lt.u32.totalorder %s615_s17, %s810_s12 }
  0x19   : > { %p619_p7 = pneg %p618_p4  ;;  %p623_p10 = por %p622_p8, %p621_p5 }
  0x1b   : > { %p625_p0 = por %p624_p9, %p623_p10 }
  0x1d   : > { %p626_p1 = pnand %p625_p0, %p619_p7 }
  0x1f   : > { %629 = shalt.err (!%p626_p1)
}
  0x20   : > { %s630_s7 = scalar_lea.vmem %s818_s14, 256  ;;  %s713_s9 = smov [#allocation2]  }
  0x21   : > { %p631_p2 = scmp.ne.s32.totalorder %s818_s14, %s630_s7  ;;  %s635_s10 = sshll.u32 %s713_s9, 4  ;;  %s636_s10 = int_to_ptr.vmem [resolvable:$false] %s635_s10 }
  0x22   : > { %s637_s11 = scalar_lea.vmem %s636_s10, 512  ;;  %p638_p11 = scmp.lt.s32.totalorder %s818_s14, %s636_s10 }
  0x23   : > { %p633_p4 = pnand %p631_p2, %p617_p3  ;;  %p639_p5 = scmp.lt.s32.totalorder %s637_s11, %s630_s7 }
  0x25   : > { %p634_p12 = pneg %p633_p4  ;;  %p640_p8 = por %p639_p5, %p638_p11 }
  0x27   : > { %p641_p9 = pnand %p640_p8, %p634_p12 }
  0x29   : > { %644 = shalt.err (!%p641_p9)
}
  0x2a   : > { %566 = dma.hbm_to_vmem [thread:$0]  (!%p814_p13), %s810_s12, 256, %s818_s14, %s188_s16  }
  0x2b   : > { %p948_p0 = scmp.lt.s32.totalorder %s711_s21, 3  ;;  %p949_p1 = scmp.ge.s32.totalorder %s711_s21, 1 }
  0x2d   : > { %p205_p3 = pnand %p949_p1, %p948_p0 }
  0x2e   : > { %s852_s13 = sand.u32 (!%p205_p3), 1, %s703_s19  }
  0x2f   : > { %208 = sbr.rel (%p205_p3) target bundleno = 824 (0x338), region = 40  ;;  %s532_s17 = sshll.u32 (!%p205_p3), %s852_s13, 4 }
  0x30   : > { %s211_s23 = scalar_lea.sflag (!%p205_p3), [#allocation3], %s852_s13  ;;  %s214_s15 = scalar_lea.vmem (!%p205_p3), [#allocation2], %s532_s17 }
  0x36   : > { %690 = dma.done.wait (%p790_p6), %s211_s23, 256  }
  0x37   : > { %692 = vsyncadd (%p790_p6), %s211_s23, 4294967040  ;;  %v862_v0 = vld [vmem:[%s214_s15] sm:$0xff]  ;;  %v864_v1 = vld [vmem:[%s214_s15 + $0x8] sm:$0xff]  ;;  %vm245_vm0 = vcmask 556032   ;;  %v714_v7 = vmov 0.0   ;;  %vm715_vm1 = vmmov 0   ;;  %v263_v15 = vlaneseq }
  0x38   : > { %v243_v2 = vmul.f32 %v862_v0, %v862_v0  ;;  %v244_v3 = vmul.f32 %v864_v1, %v864_v1  ;;  %v260_v6 = vld [vmem:[%s937_s1] sm:$0xff]  ;;  %549 = vmatprep.subr.mxu0 %v714_v7  ;;  %551 = vmatprep.mubr.msk.f32.mxu0 %vm715_vm1, %v714_v7  ;;  %vm269_vm4 = vcmask 64512   ;;  %vm349_vm5 = vcmask 1043456   ;;  %s544_s7 = sshll.u32 %s768_s22, 8  ;;  %s240_s9 = scalar_lea.vmem [#allocation5], %s532_s17 }
  0x39   : > { %550 = vmatpush3.msra.mxu0 %v260_v6  ;;  %554 = vmatprep.subr.mxu1 %v714_v7  ;;  %v264_v16 = vand.u32 127, %v263_v15  ;;  %v266_v17 = vshrl.u32 %v263_v15, 7  ;;  %v343_v22 = vld [vmem:[%s939_s3] sm:$0xf]  ;;  %vm345_vm6 = vcmask 31744   ;;  %s455_s10 = sshll.u32 %s240_s9, 4  ;;  %s891_s15 = scalar_lea.hbm %s941_s5, %s544_s7  ;;  %s893_s10 = int_to_ptr.vmem [resolvable:$true] %s455_s10 }
  0x3a   : > { %v246_v4 = vsel %vm245_vm0, %v244_v3, 0.0  ;;  %556 = vmatprep.mubr.msk.f32.mxu1 %vm715_vm1, %v714_v7  ;;  %555 = vmatpush3.msk.msra.mxu1 %vm349_vm5, %v343_v22  ;;  %v261_v23 = vld [vmem:[%s938_s2] sm:$0x1]  ;;  %s441_s22 = scalar_lea.sflag [#allocation4], %s852_s13  ;;  %s645_s17 = scalar_lea.vmem %s893_s10, 256 }
  0x3b   : > { %v247_v5 = vadd.f32 %v246_v4, %v243_v2  ;;  %v267_v18 = vsub.s32 %v264_v16, %v266_v17  ;;  %v344_v28 = vld [vmem:[%s940_s4] sm:$0x1]  ;;  %v431_v35 = vsub.s32 0, %v266_v17  ;;  %p646_p6 = scmp.ne.s32.totalorder %s893_s10, %s645_s17  ;;  %p950_p11 = scmp.ne.s32.totalorder %s945_s30, 0 }
  0x3c   : > { %s716_s12 = smov [#allocation5]  }
  0x3d   : > { %248 = vadd.xlane.f32.xlu0 %v247_v5  ;;  %p647_p12 = pnand %p646_p6, %p950_p11  ;;  %s649_s14 = sshll.u32 %s716_s12, 4  ;;  %s650_s14 = int_to_ptr.vmem [resolvable:$false] %s649_s14 }
  0x3e   : > { %s651_s29 = scalar_lea.vmem %s650_s14, 512  ;;  %p652_p7 = scmp.lt.s32.totalorder %s893_s10, %s650_s14 }
  0x3f   : > { %p648_p13 = pneg %p647_p12  ;;  %p653_p10 = scmp.lt.s32.totalorder %s651_s29, %s645_s17 }
  0x41   : > { %p654_p2 = por %p653_p10, %p652_p7 }
  0x43   : > { %p655_p4 = pnand %p654_p2, %p648_p13 }
  0xca   : > { %v249_v8 = vpop.xlane.xlu0 %248 }
  0xcb   : > { %607 = vrsqrt.f32 %v249_v8  ;;  %vm252_vm2 = vcmp.eq.f32.partialorder %v249_v8, inf  ;;  %v255_v11 = vand.u32 2147483648, %v249_v8  ;;  %vm254_vm3 = vcmp.eq.f32.partialorder %v249_v8, 0.0 }
  0xd5   : > { %v608_v9 = vpop.eup %607 }
  0xd6   : > { %v251_v10 = vmul.f32 %v608_v9, %v249_v8 }
  0xd8   : > { %v253_v12 = vsel %vm252_vm2, %v249_v8, %v251_v10 }
  0xd9   : > { %v256_v13 = vsel %vm254_vm3, %v255_v11, %v253_v12 }
  0xda   : > { %v257_v14 = vadd.f32 1e-06, %v256_v13 }
  0xdc   : > { %609 = vrcp.f32 %v257_v14 }
  0xe6   : > { %v610_v19 = vpop.eup %609 }
  0xe7   : > { %v259_v20 = vmul.f32 %v610_v19, %v256_v13 }
  0xe9   : > { %v268_v21 = vrot.slane %v259_v20, %v267_v18 }
  0xeb   : > { %552 = vmatmul.mubr.msk.f32.vlgmr.msra.gmra.mrb[0].mxu0 %vm269_vm4, %v268_v21 }
 0x1be   : > { %v338_v24 = vpop.f32.mrb[0].mxu0 }
 0x1bf   : > { %v339_v25 = vadd.f32 %v338_v24, %v261_v23  ;;  %v553_v26 = vpop.f32.mrb[1].mxu0 }
 0x1c1   : > { %v342_v27 = vmax.f32 %v339_v25, 0.0 }
 0x1c3   : > { %557 = vmatmul.mubr.msk.f32.vlgmr.msra.gmra.mrb[0].mxu1 %vm345_vm6, %v342_v27 }
 0x296   : > { %v419_v29 = vpop.f32.mrb[0].mxu1 }
 0x297   : > { %v420_v30 = vadd.f32 %v419_v29, %v344_v28  ;;  %v558_v31 = vpop.f32.mrb[1].mxu1 }
 0x299   : > { %v537_v32 = vmul.f32 -1.442695, %v420_v30 }
 0x29b   : > { %611 = vpow2.f32 %v537_v32 }
 0x2a5   : > { %v612_v33 = vpop.eup %611 }
 0x2a6   : > { %v426_v34 = vadd.f32 1.0, %v612_v33 }
 0x2a8   : > { %613 = vrcp.f32 %v426_v34 }
 0x2b2   : > { %v614_v36 = vpop.eup %613 }
 0x2b3   : > { %v432_v37 = vrot.slane %v614_v36, %v431_v35 }
 0x2b5   : > { %434 = vbcast.lane.b32.xlu0 %v432_v37, 256 }
 0x327   : > { %v435_v38 = vpop.permute.xlu0 %434 }
 0x328   : > { %v436_v39 = vmul.f32 %v435_v38, %v862_v0  ;;  %v437_v40 = vmul.f32 %v435_v38, %v864_v1 }
 0x32a   : > { %438 = vst [vmem:[%s240_s9] sm:$0xff] %v436_v39  ;;  %439 = vst.msk [vmem:[%s240_s9 + $0x8] sm:$0xff] %vm245_vm0, %v437_v40 }
 0x32b   : > { %658 = shalt.err (!%p655_p4)
}
 0x32c   : > { %s659_s13 = scalar_lea.hbm %s891_s15, 256  ;;  %s663_s26 = scalar_lea.hbm %s941_s5, 512 }
 0x32d   : > { %p660_p5 = scmp.ne.s32.totalorder %s891_s15, %s659_s13  ;;  %p664_p0 = scmp.lt.u32.totalorder %s891_s15, %s941_s5 }
 0x32e   : > { %p665_p1 = scmp.lt.u32.totalorder %s663_s26, %s659_s13  ;;  %p667_p6 = scmp.lt.u32.totalorder %s659_s13, %s891_s15 }
 0x32f   : > { %p661_p8 = pnand %p660_p5, %p950_p11 }
 0x330   : > { %p666_p3 = por %p665_p1, %p664_p0 }
 0x331   : > { %p662_p9 = pneg %p661_p8 }
 0x332   : > { %p668_p12 = por %p667_p6, %p666_p3 }
 0x334   : > { %p669_p13 = pnand %p668_p12, %p662_p9 }
 0x336   : > { %672 = shalt.err (!%p669_p13)
}
 0x337   : > { %561 = dma.vmem_to_hbm [thread:$0]  (%p950_p11), %s893_s10, 256, %s891_s15, %s441_s22  }
 0x338 PF: > { %s467_s7 = sand.u32 1, %s699_s18   ;;  %p951_p7 = scmp.ne.s32.totalorder %s946_s6, 0 }
 0x339   : > { %p952_p10 = scmp.ge.s32.totalorder %s711_s21, 2  ;;  %s468_s9 = scalar_lea.sflag [#allocation4], %s467_s7 }
 0x33b   : > { %p568_p2 = pnand %p952_p10, %p951_p7 }
 0x33d   : > { %694 = dma.done.wait (!%p568_p2), %s468_s9, 256  }
 0x33e   : > { %696 = vsyncadd (!%p568_p2), %s468_s9, 4294967040  ;;  %p18_p4 = scmp.ge.s32.totalorder %s772_s24, 4   ;;  %s953_s18 = smov %s703_s19 }
 0x33f   : > { %s954_s19 = smov %s707_s20  ;;  %s955_s20 = smov %s784_s27 }
 0x340   : > { %s956_s21 = smov %s772_s24  ;;  %20 = sbr.rel (!%p18_p4) target bundleno = 5 (0x5), region = 85 }
 0x347   :  { %473 = vsyncpa [#allocation3], 1 }
 0x348   :  { %475 = vsyncpa [#allocation3 + $0x1], 1 }
 0x349   :  { %476 = vsyncpa [#allocation4], 1 }
 0x34a   :  { %478 = vsyncpa [#allocation4 + $0x1], 1 }

</bundles_post_ra>
